<compile_context>
chip_gen: v5e
topology: v5e:2x2
jax: 0.10.0
libtpu: 0.0.40
codegen_flags: <defaults>
</compile_context>

<pallas_src>
import functools

import jax
import jax.numpy as jnp
import numpy as np
from jax.experimental import pallas as pl
from jax.experimental.pallas import tpu as pltpu

# Logical rows packed per kernel row: 16 rows * 4 chunks * {sum, wsum} = 128
# matmul output lanes => fully lane-dense epilogue.
_G = 16


def _round_up(x, m):
    return ((x + m - 1) // m) * m


def integral_average_kernel(x_ref, m_ref, o_ref):
    """x_ref: (T, G*4*K) packed rows, m_ref: (G*4*K, 8*G), o_ref: (T, 2*G) f32."""
    # One MXU matmul computes all per-chunk sums and weighted sums at once.
    r = jnp.dot(x_ref[...], m_ref[...], preferred_element_type=jnp.float32)
    h = r.shape[-1] // 2
    sums = r[:, :h]                    # per-chunk row sums       (T, 4G)
    wsum = r[:, h:]                    # per-chunk weighted sums  (T, 4G)
    e = wsum / sums                    # per-chunk expectations (exact divide)
    # Lane layout of e: lane = (c%2)*2G + 2g + c//2, so summing the two halves
    # realizes reshape(-1, 2, 2).sum(-1) as one contiguous half-slice add.
    q = e.shape[-1] // 2
    o_ref[...] = (e[:, :q] + e[:, q:]).astype(o_ref.dtype)


@functools.lru_cache(maxsize=None)
def _reduction_matrix_np(reg_max, group):
    """Constant (group*4*K, 8*group) block-diagonal reduction matrix."""
    K = reg_max + 1
    space = (np.linspace(0.0, float(reg_max), K, dtype=np.float32)
             / float(reg_max) / 2.0)
    Wi = group * 4 * K
    M = np.zeros((Wi, 8 * group), dtype=np.float32)
    half = 2 * group                                   # 32 lanes per fold half
    for g in range(group):
        for c in range(4):
            rows = slice((g * 4 + c) * K, (g * 4 + c + 1) * K)
            p, j = c % 2, c // 2
            col = p * half + 2 * g + j
            M[rows, col] = 1.0                         # row-sum column
            M[rows, 4 * group + col] = space           # weighted-sum column
    return M


@functools.partial(jax.jit, static_argnames=("reg_max", "max_tile_rows"))
def integral_average(x, reg_max=16, max_tile_rows=1024):
    """x: (N, 4*(reg_max+1)) float32/bfloat16 -> (N, 2) float32."""
    N = x.shape[0]
    K = reg_max + 1
    assert x.shape[1] == 4 * K, x.shape
    G = _G
    Wi = G * 4 * K                     # packed input width  (1088 for reg_max=16)
    Wo = 2 * G                         # packed output width (32)

    # Pad only to a multiple of G (bounded: <= 15 extra rows of HBM traffic).
    # Padded rows are filled with 1.0 (finite) and sliced off below.
    N_pad = _round_up(max(N, 1), G)
    if N_pad != N:
        x = jnp.pad(x, ((0, N_pad - N), (0, 0)), constant_values=1.0)
    Np = N_pad // G
    xp = x.reshape(Np, Wi)             # free: row-major contiguous repack

    # Reduction matrix in the input dtype (weights k/32 are exact in bf16 for
    # reg_max=16), baked in as a jit constant and cached across calls.
    M = jnp.asarray(_reduction_matrix_np(reg_max, G), dtype=x.dtype)

    # Packed-row tile: multiple of 8, capped for VMEM, and chosen so the grid
    # has >= 2 steps whenever possible (both v7x TensorCores get work).
    if Np <= 8:
        tile = Np
    else:
        tile = max(8, min(max_tile_rows, _round_up(pl.cdiv(Np, 2), 8)))
    grid = (pl.cdiv(Np, tile),)

    itemsize = x.dtype.itemsize
    cost = pl.CostEstimate(
        flops=2 * Np * Wi * 8 * G,
        transcendentals=0,
        bytes_accessed=Np * Wi * itemsize + Wi * 8 * G * itemsize + Np * Wo * 4,
    )

    out = pl.pallas_call(
        integral_average_kernel,
        out_shape=jax.ShapeDtypeStruct((Np, Wo), jnp.float32),
        grid=grid,
        in_specs=[
            pl.BlockSpec((tile, Wi), lambda i: (i, 0)),
            # Constant block index -> fetched once, not re-DMA'd per step.
            pl.BlockSpec((Wi, 8 * G), lambda i: (0, 0)),
        ],
        out_specs=pl.BlockSpec((tile, Wo), lambda i: (i, 0)),
        compiler_params=pltpu.CompilerParams(
            dimension_semantics=("parallel",)),
        cost_estimate=cost,
    )(xp, M)

    # Free row-major unpack back to (N, 2).
    return out.reshape(N_pad, 2)[:N]


def integral_average_ref(x, reg_max=16):
    """Pure-JAX reference mirroring the PyTorch code exactly."""
    K = reg_max + 1
    x = x.astype(jnp.float32).reshape(-1, K)
    x = x / jnp.sum(x, axis=1, keepdims=True)
    space = jnp.linspace(0.0, float(reg_max), K, dtype=jnp.float32) / reg_max / 2.0
    x = x * space
    return jnp.sum(x, axis=1).reshape(-1, 2, 2).sum(2)


if __name__ == "__main__":
    reg_max = 16
    C = 4 * (reg_max + 1)
    k1, k2, k3 = jax.random.split(jax.random.PRNGKey(0), 3)

    # Case 1: tiny N, exercises the pad-to-multiple-of-16 path, single block.
    x1 = jax.random.uniform(k1, (8, C), jnp.float32, 0.1, 1.1)
    out1 = jax.block_until_ready(integral_average(x1, reg_max=reg_max))
    np.testing.assert_allclose(np.asarray(out1),
                               np.asarray(integral_average_ref(x1, reg_max)),
                               rtol=1e-5, atol=1e-6)

    # Case 2: N not a multiple of 16 -> small pad, 2-step grid, ragged last block.
    x2 = jax.random.uniform(k2, (300, C), jnp.float32, 0.1, 1.1)
    out2 = jax.block_until_ready(integral_average(x2, reg_max=reg_max))
    np.testing.assert_allclose(np.asarray(out2),
                               np.asarray(integral_average_ref(x2, reg_max)),
                               rtol=1e-5, atol=1e-6)

    # Case 3: bf16 activations stream straight into the MXU (no in-kernel
    # upcast, half the HBM read traffic).
    x3 = jax.random.uniform(k3, (64, C), jnp.float32, 0.1, 1.1).astype(jnp.bfloat16)
    out3 = jax.block_until_ready(integral_average(x3, reg_max=reg_max))
    np.testing.assert_allclose(np.asarray(out3),
                               np.asarray(integral_average_ref(x3, reg_max)),
                               rtol=1e-4, atol=1e-5)

    print("KERNEL_OK")
</pallas_src>

<mosaic_0001>
module attributes {stable_mosaic.version = 11 : i64} {
  func.func @integral_average_kernel(%arg0: i32, %arg1: memref<1x1088xf32, #tpu.memory_space<vmem>>, %arg2: memref<1088x128xf32, #tpu.memory_space<vmem>>, %arg3: memref<1x32xf32, #tpu.memory_space<vmem>>) attributes {dimension_semantics = [#tpu.dimension_semantics<parallel>], iteration_bounds = array<i64: 1>, scalar_prefetch = 0 : i64, scratch_operands = 0 : i64, tpu.core_type = #tpu.core_type<tc>, window_params = [{transform_indices = @transform_0, window_bounds = array<i64: 1, 1088>}, {pipeline_mode = #tpu.pipeline_mode<synchronous>, transform_indices = @transform_1, window_bounds = array<i64: 1088, 128>}, {transform_indices = @transform_2, window_bounds = array<i64: 1, 32>}]} {
    %c0 = arith.constant 0 : index
    %c0_0 = arith.constant 0 : index
    %0 = vector.load %arg1[%c0, %c0_0] : memref<1x1088xf32, #tpu.memory_space<vmem>>, vector<1x1088xf32>
    %c0_1 = arith.constant 0 : index
    %c0_2 = arith.constant 0 : index
    %1 = vector.load %arg2[%c0_1, %c0_2] : memref<1088x128xf32, #tpu.memory_space<vmem>>, vector<1088x128xf32>
    %cst = arith.constant dense<0.000000e+00> : vector<1x128xf32>
    %2 = tpu.matmul %0, %1, %cst {dimension_numbers = #tpu.dot_dimension_numbers<[1], [0], [0], [1], [0, 0, 1, 1], [], []>} : vector<1x1088xf32>, vector<1088x128xf32>, vector<1x128xf32> -> vector<1x128xf32>
    %3 = vector.extract_strided_slice %2 {offsets = [0, 0], sizes = [1, 64], strides = [1, 1]} : vector<1x128xf32> to vector<1x64xf32>
    %4 = vector.extract_strided_slice %2 {offsets = [0, 64], sizes = [1, 64], strides = [1, 1]} : vector<1x128xf32> to vector<1x64xf32>
    %5 = arith.divf %4, %3 : vector<1x64xf32>
    %6 = vector.extract_strided_slice %5 {offsets = [0, 0], sizes = [1, 32], strides = [1, 1]} : vector<1x64xf32> to vector<1x32xf32>
    %7 = vector.extract_strided_slice %5 {offsets = [0, 32], sizes = [1, 32], strides = [1, 1]} : vector<1x64xf32> to vector<1x32xf32>
    %8 = arith.addf %6, %7 : vector<1x32xf32>
    %c0_3 = arith.constant 0 : index
    %c0_4 = arith.constant 0 : index
    %9 = vector.load %arg3[%c0_3, %c0_4] : memref<1x32xf32, #tpu.memory_space<vmem>>, vector<1x32xf32>
    tpu.vector_store %arg3[%c0_3, %c0_4], %8 {strides = array<i32>} : memref<1x32xf32, #tpu.memory_space<vmem>>, vector<1x32xf32>,
    return
  }
  func.func @transform_0(%arg0: i32) -> (i32, i32) {
    %c0_i32 = arith.constant 0 : i32
    %c0_i32_0 = arith.constant 0 : i32
    return %arg0, %c0_i32 : i32, i32
  }
  func.func @transform_1(%arg0: i32) -> (i32, i32) {
    %c0_i32 = arith.constant 0 : i32
    %c0_i32_0 = arith.constant 0 : i32
    %c0_i32_1 = arith.constant 0 : i32
    return %c0_i32, %c0_i32_0 : i32, i32
  }
  func.func @transform_2(%arg0: i32) -> (i32, i32) {
    %c0_i32 = arith.constant 0 : i32
    %c0_i32_0 = arith.constant 0 : i32
    return %arg0, %c0_i32 : i32, i32
  }
}

</mosaic_0001>

<bundles_post_ra>
// kernel: integral_average.1
= control target key start
LH: loop header
LB: loop body
LE: loop exit
PB: predicated region body
PF: predicated region fallthrough
CT: control target
= control target key end

     0   :  { %7 = vsyncpa [#allocation3], 0  ;;  %s437_s12 = smov [#allocation2]   ;;  %s438_s14 = smov 128   ;;  %s479_s0 = inlined_call_operand.vmem [shape: f32[1,1088], index: 0, kind: input, shape index: {}]   ;;  %s480_s1 = inlined_call_operand.hbm [shape: f32[1088,128], index: 1, kind: input, shape index: {}]   ;;  %s481_s2 = inlined_call_operand.vmem [shape: f32[1,32], index: 2, kind: output, shape index: {}]  }
   0x1   :  { %s14_s11 = sshll.u32 %s480_s1, 4  ;;  %s16_s13 = sshll.u32 %s437_s12, 4  ;;  %s15_s11 = int_to_ptr.hbm [resolvable:$true] %s14_s11  ;;  %s17_s13 = int_to_ptr.vmem [resolvable:$true] %s16_s13 }
   0x2   :  { %s439_s15 = smov 8  }
   0x3   :  { %22 = dma.hbm_to_vmem [thread:$0]  %s15_s11, 17408, %s17_s13, [#allocation3], %s438_s14, %s438_s14, %s439_s15  }
   0x4   :  { %435 = dma.done.wait [#allocation3], 17408  }
   0x5   :  { %436 = vsyncadd [#allocation3], 4294949888  ;;  %v44_v0 = vld [vmem:[#allocation2 + $0x78] sm:$0xff]  ;;  %v43_v1 = vld [vmem:[#allocation2 + $0x70] sm:$0xff]  ;;  %vm184_vm0 = vcmask 523264   ;;  %s441_s19 = smov 96  }
   0x6   :  { %v76_v2 = vld [vmem:[#allocation2 + $0x178] sm:$0xff]  ;;  %187 = vmatpush.msra.mxu0 %v44_v0  ;;  %v75_v3 = vld [vmem:[#allocation2 + $0x170] sm:$0xff]  ;;  %v42_v5 = vld [vmem:[#allocation2 + $0x68] sm:$0xff]  ;;  %vm395_vm5 = vcmask 253952  }
   0x7   :  { %227 = vmatpush.msra.mxu2 %v76_v2  ;;  %v92_v4 = vld [vmem:[#allocation2 + $0x1f8] sm:$0xff]  ;;  %v74_v7 = vld [vmem:[#allocation2 + $0x168] sm:$0xff]  ;;  %v91_v8 = vld [vmem:[#allocation2 + $0x1f0] sm:$0xff] }
   0x8   :  { %247 = vmatpush.msra.mxu3 %v92_v4  ;;  %v60_v6 = vld [vmem:[#allocation2 + $0xf8] sm:$0xff]  ;;  %188 = vmatpush.msra.mxu0 %v43_v1  ;;  %v59_v9 = vld [vmem:[#allocation2 + $0xf0] sm:$0xff]  ;;  %v41_v10 = vld [vmem:[#allocation2 + $0x60] sm:$0xff] }
   0x9   :  { %228 = vmatpush.msra.mxu2 %v75_v3  ;;  %207 = vmatpush.msra.mxu1 %v60_v6  ;;  %v73_v11 = vld [vmem:[#allocation2 + $0x160] sm:$0xff]  ;;  %v90_v12 = vld [vmem:[#allocation2 + $0x1e8] sm:$0xff]  ;;  %v40_v15 = vld [vmem:[#allocation2 + $0x58] sm:$0xff] }
   0xa   :  { %248 = vmatpush.msra.mxu3 %v91_v8  ;;  %189 = vmatpush.msra.mxu0 %v42_v5  ;;  %v58_v13 = vld [vmem:[#allocation2 + $0xe8] sm:$0xff]  ;;  %v89_v14 = vld [vmem:[#allocation2 + $0x1e0] sm:$0xff]  ;;  %v72_v16 = vld [vmem:[#allocation2 + $0x158] sm:$0xff] }
   0xb   :  { %229 = vmatpush.msra.mxu2 %v74_v7  ;;  %208 = vmatpush.msra.mxu1 %v59_v9  ;;  %v57_v17 = vld [vmem:[#allocation2 + $0xe0] sm:$0xff]  ;;  %v88_v18 = vld [vmem:[#allocation2 + $0x1d8] sm:$0xff]  ;;  %v39_v19 = vld [vmem:[#allocation2 + $0x50] sm:$0xff] }
   0xc   :  { %249 = vmatpush.msra.mxu3 %v90_v12  ;;  %190 = vmatpush.msra.mxu0 %v41_v10  ;;  %v71_v20 = vld [vmem:[#allocation2 + $0x150] sm:$0xff]  ;;  %v56_v21 = vld [vmem:[#allocation2 + $0xd8] sm:$0xff]  ;;  %v38_v23 = vld [vmem:[#allocation2 + $0x48] sm:$0xff] }
   0xd   :  { %230 = vmatpush.msra.mxu2 %v73_v11  ;;  %209 = vmatpush.msra.mxu1 %v58_v13  ;;  %v87_v22 = vld [vmem:[#allocation2 + $0x1d0] sm:$0xff]  ;;  %v70_v24 = vld [vmem:[#allocation2 + $0x148] sm:$0xff]  ;;  %v37_v27 = vld [vmem:[#allocation2 + $0x40] sm:$0xff] }
   0xe   :  { %250 = vmatpush.msra.mxu3 %v89_v14  ;;  %191 = vmatpush.msra.mxu0 %v40_v15  ;;  %v55_v25 = vld [vmem:[#allocation2 + $0xd0] sm:$0xff]  ;;  %v86_v26 = vld [vmem:[#allocation2 + $0x1c8] sm:$0xff]  ;;  %v69_v28 = vld [vmem:[#allocation2 + $0x140] sm:$0xff] }
   0xf   :  { %231 = vmatpush.msra.mxu2 %v72_v16  ;;  %210 = vmatpush.msra.mxu1 %v57_v17  ;;  %v54_v29 = vld [vmem:[#allocation2 + $0xc8] sm:$0xff]  ;;  %v85_v30 = vld [vmem:[#allocation2 + $0x1c0] sm:$0xff]  ;;  %v36_v31 = vld [vmem:[#allocation2 + $0x38] sm:$0xff] }
  0x10   :  { %251 = vmatpush.msra.mxu3 %v88_v18  ;;  %192 = vmatpush.msra.mxu0 %v39_v19  ;;  %v68_v32 = vld [vmem:[#allocation2 + $0x138] sm:$0xff]  ;;  %v53_v33 = vld [vmem:[#allocation2 + $0xc0] sm:$0xff]  ;;  %v35_v35 = vld [vmem:[#allocation2 + $0x30] sm:$0xff] }
  0x11   :  { %232 = vmatpush.msra.mxu2 %v71_v20  ;;  %211 = vmatpush.msra.mxu1 %v56_v21  ;;  %v84_v34 = vld [vmem:[#allocation2 + $0x1b8] sm:$0xff]  ;;  %v67_v36 = vld [vmem:[#allocation2 + $0x130] sm:$0xff]  ;;  %v34_v39 = vld [vmem:[#allocation2 + $0x28] sm:$0xff] }
  0x12   :  { %252 = vmatpush.msra.mxu3 %v87_v22  ;;  %193 = vmatpush.msra.mxu0 %v38_v23  ;;  %v52_v37 = vld [vmem:[#allocation2 + $0xb8] sm:$0xff]  ;;  %v83_v38 = vld [vmem:[#allocation2 + $0x1b0] sm:$0xff]  ;;  %v66_v40 = vld [vmem:[#allocation2 + $0x128] sm:$0xff] }
  0x13   :  { %233 = vmatpush.msra.mxu2 %v70_v24  ;;  %212 = vmatpush.msra.mxu1 %v55_v25  ;;  %v51_v41 = vld [vmem:[#allocation2 + $0xb0] sm:$0xff]  ;;  %v82_v42 = vld [vmem:[#allocation2 + $0x1a8] sm:$0xff]  ;;  %v33_v43 = vld [vmem:[#allocation2 + $0x20] sm:$0xff] }
  0x14   :  { %253 = vmatpush.msra.mxu3 %v86_v26  ;;  %194 = vmatpush.msra.mxu0 %v37_v27  ;;  %v65_v44 = vld [vmem:[#allocation2 + $0x120] sm:$0xff]  ;;  %v50_v45 = vld [vmem:[#allocation2 + $0xa8] sm:$0xff]  ;;  %v32_v47 = vld [vmem:[#allocation2 + $0x18] sm:$0xff] }
  0x15   :  { %234 = vmatpush.msra.mxu2 %v69_v28  ;;  %213 = vmatpush.msra.mxu1 %v54_v29  ;;  %v81_v46 = vld [vmem:[#allocation2 + $0x1a0] sm:$0xff]  ;;  %v64_v48 = vld [vmem:[#allocation2 + $0x118] sm:$0xff]  ;;  %v31_v51 = vld [vmem:[#allocation2 + $0x10] sm:$0xff] }
  0x16   :  { %254 = vmatpush.msra.mxu3 %v85_v30  ;;  %195 = vmatpush.msra.mxu0 %v36_v31  ;;  %v49_v49 = vld [vmem:[#allocation2 + $0xa0] sm:$0xff]  ;;  %v80_v50 = vld [vmem:[#allocation2 + $0x198] sm:$0xff]  ;;  %v63_v52 = vld [vmem:[#allocation2 + $0x110] sm:$0xff] }
  0x17   :  { %235 = vmatpush.msra.mxu2 %v68_v32  ;;  %214 = vmatpush.msra.mxu1 %v53_v33  ;;  %v48_v53 = vld [vmem:[#allocation2 + $0x98] sm:$0xff]  ;;  %v79_v54 = vld [vmem:[#allocation2 + $0x190] sm:$0xff]  ;;  %v30_v55 = vld [vmem:[#allocation2 + $0x8] sm:$0xff] }
  0x18   :  { %255 = vmatpush.msra.mxu3 %v84_v34  ;;  %196 = vmatpush.msra.mxu0 %v35_v35  ;;  %v62_v56 = vld [vmem:[#allocation2 + $0x108] sm:$0xff]  ;;  %v47_v57 = vld [vmem:[#allocation2 + $0x90] sm:$0xff]  ;;  %v29_v59 = vld [vmem:[#allocation2] sm:$0xff] }
  0x19   :  { %236 = vmatpush.msra.mxu2 %v67_v36  ;;  %215 = vmatpush.msra.mxu1 %v52_v37  ;;  %v78_v58 = vld [vmem:[#allocation2 + $0x188] sm:$0xff]  ;;  %v61_v60 = vld [vmem:[#allocation2 + $0x100] sm:$0xff]  ;;  %v108_v61 = vld [vmem:[#allocation2 + $0x278] sm:$0xff] }
  0x1a   :  { %256 = vmatpush.msra.mxu3 %v83_v38  ;;  %197 = vmatpush.msra.mxu0 %v34_v39  ;;  %v140_v62 = vld [vmem:[#allocation2 + $0x378] sm:$0xff]  ;;  %v46_v63 = vld [vmem:[#allocation2 + $0x88] sm:$0xff]  ;;  %v77_v0 = vld [vmem:[#allocation2 + $0x180] sm:$0xff] }
  0x1b   :  { %237 = vmatpush.msra.mxu2 %v66_v40  ;;  %216 = vmatpush.msra.mxu1 %v51_v41  ;;  %v107_v1 = vld [vmem:[#allocation2 + $0x270] sm:$0xff]  ;;  %v156_v3 = vld [vmem:[#allocation2 + $0x3f8] sm:$0xff]  ;;  %v45_v4 = vld [vmem:[#allocation2 + $0x80] sm:$0xff] }
  0x1c   :  { %257 = vmatpush.msra.mxu3 %v82_v42  ;;  %198 = vmatpush.msra.mxu0 %v33_v43  ;;  %v139_v2 = vld [vmem:[#allocation2 + $0x370] sm:$0xff]  ;;  %v106_v5 = vld [vmem:[#allocation2 + $0x268] sm:$0xff]  ;;  %v124_v6 = vld [vmem:[#allocation2 + $0x2f8] sm:$0xff] }
  0x1d   :  { %238 = vmatpush.msra.mxu2 %v65_v44  ;;  %217 = vmatpush.msra.mxu1 %v50_v45  ;;  %v138_v7 = vld [vmem:[#allocation2 + $0x368] sm:$0xff]  ;;  %v155_v8 = vld [vmem:[#allocation2 + $0x3f0] sm:$0xff]  ;;  %v105_v9 = vld [vmem:[#allocation2 + $0x260] sm:$0xff] }
  0x1e   :  { %258 = vmatpush.msra.mxu3 %v81_v46  ;;  %199 = vmatpush.msra.mxu0 %v32_v47  ;;  %v123_v10 = vld [vmem:[#allocation2 + $0x2f0] sm:$0xff]  ;;  %v137_v11 = vld [vmem:[#allocation2 + $0x360] sm:$0xff]  ;;  %v154_v12 = vld [vmem:[#allocation2 + $0x3e8] sm:$0xff] }
  0x1f   :  { %239 = vmatpush.msra.mxu2 %v64_v48  ;;  %218 = vmatpush.msra.mxu1 %v49_v49  ;;  %v104_v13 = vld [vmem:[#allocation2 + $0x258] sm:$0xff]  ;;  %v122_v14 = vld [vmem:[#allocation2 + $0x2e8] sm:$0xff]  ;;  %v153_v16 = vld [vmem:[#allocation2 + $0x3e0] sm:$0xff] }
  0x20   :  { %259 = vmatpush.msra.mxu3 %v80_v50  ;;  %200 = vmatpush.msra.mxu0 %v31_v51  ;;  %v136_v15 = vld [vmem:[#allocation2 + $0x358] sm:$0xff]  ;;  %v103_v17 = vld [vmem:[#allocation2 + $0x250] sm:$0xff]  ;;  %v121_v18 = vld [vmem:[#allocation2 + $0x2e0] sm:$0xff] }
  0x21   :  { %240 = vmatpush.msra.mxu2 %v63_v52  ;;  %219 = vmatpush.msra.mxu1 %v48_v53  ;;  %v135_v19 = vld [vmem:[#allocation2 + $0x350] sm:$0xff]  ;;  %v152_v20 = vld [vmem:[#allocation2 + $0x3d8] sm:$0xff]  ;;  %v102_v21 = vld [vmem:[#allocation2 + $0x248] sm:$0xff] }
  0x22   :  { %260 = vmatpush.msra.mxu3 %v79_v54  ;;  %201 = vmatpush.msra.mxu0 %v30_v55  ;;  %v120_v22 = vld [vmem:[#allocation2 + $0x2d8] sm:$0xff]  ;;  %v134_v23 = vld [vmem:[#allocation2 + $0x348] sm:$0xff]  ;;  %v151_v24 = vld [vmem:[#allocation2 + $0x3d0] sm:$0xff] }
  0x23   :  { %241 = vmatpush.msra.mxu2 %v62_v56  ;;  %220 = vmatpush.msra.mxu1 %v47_v57  ;;  %v101_v25 = vld [vmem:[#allocation2 + $0x240] sm:$0xff]  ;;  %v119_v26 = vld [vmem:[#allocation2 + $0x2d0] sm:$0xff]  ;;  %v150_v28 = vld [vmem:[#allocation2 + $0x3c8] sm:$0xff] }
  0x24   :  { %261 = vmatpush.msra.mxu3 %v78_v58  ;;  %202 = vmatpush.msra.mxu0 %v29_v59  ;;  %v133_v27 = vld [vmem:[#allocation2 + $0x340] sm:$0xff]  ;;  %v100_v29 = vld [vmem:[#allocation2 + $0x238] sm:$0xff]  ;;  %v118_v30 = vld [vmem:[#allocation2 + $0x2c8] sm:$0xff] }
  0x25   :  { %242 = vmatpush.msra.mxu2 %v61_v60  ;;  %221 = vmatpush.msra.mxu1 %v46_v63  ;;  %v132_v31 = vld [vmem:[#allocation2 + $0x338] sm:$0xff]  ;;  %v149_v32 = vld [vmem:[#allocation2 + $0x3c0] sm:$0xff]  ;;  %v99_v33 = vld [vmem:[#allocation2 + $0x230] sm:$0xff] }
  0x26   :  { %267 = vmatpush.msrb.mxu0 %v108_v61  ;;  %262 = vmatpush.msra.mxu3 %v77_v0  ;;  %v117_v34 = vld [vmem:[#allocation2 + $0x2c0] sm:$0xff]  ;;  %v131_v35 = vld [vmem:[#allocation2 + $0x330] sm:$0xff]  ;;  %v148_v36 = vld [vmem:[#allocation2 + $0x3b8] sm:$0xff] }
  0x27   :  { %307 = vmatpush.msrb.mxu2 %v140_v62  ;;  %222 = vmatpush.msra.mxu1 %v45_v4  ;;  %v98_v37 = vld [vmem:[#allocation2 + $0x228] sm:$0xff]  ;;  %v116_v38 = vld [vmem:[#allocation2 + $0x2b8] sm:$0xff]  ;;  %v463_v39 = vld [vmem:[%s479_s0] sm:$0xff] }
  0x28   :  { %268 = vmatpush.msrb.mxu0 %v107_v1  ;;  %327 = vmatpush.msrb.mxu3 %v156_v3  ;;  %v130_v40 = vld [vmem:[#allocation2 + $0x328] sm:$0xff]  ;;  %v147_v41 = vld [vmem:[#allocation2 + $0x3b0] sm:$0xff]  ;;  %v97_v42 = vld [vmem:[#allocation2 + $0x220] sm:$0xff]  ;;  %v169_v46 = vperm.slane %v463_v39, 2  ;;  %v167_v52 = vperm.slane %v463_v39, 0  ;;  %v170_v53 = vperm.slane %v463_v39, 3 }
  0x29   :  { %308 = vmatpush.msrb.mxu2 %v139_v2  ;;  %287 = vmatpush.msrb.mxu1 %v124_v6  ;;  %v115_v43 = vld [vmem:[#allocation2 + $0x2b0] sm:$0xff]  ;;  %v129_v44 = vld [vmem:[#allocation2 + $0x320] sm:$0xff]  ;;  %v146_v45 = vld [vmem:[#allocation2 + $0x3a8] sm:$0xff]  ;;  %v168_v58 = vperm.slane %v463_v39, 1  ;;  %v173_v4 = vperm.slane %v463_v39, 6 }
  0x2a   :  { %269 = vmatpush.msrb.mxu0 %v106_v5  ;;  %328 = vmatpush.msrb.mxu3 %v155_v8  ;;  %v96_v47 = vld [vmem:[#allocation2 + $0x218] sm:$0xff]  ;;  %v114_v48 = vld [vmem:[#allocation2 + $0x2a8] sm:$0xff]  ;;  %v95_v50 = vld [vmem:[#allocation2 + $0x210] sm:$0xff]  ;;  %v171_v8 = vperm.slane %v463_v39, 4 }
  0x2b   :  { %309 = vmatpush.msrb.mxu2 %v138_v7  ;;  %288 = vmatpush.msrb.mxu1 %v123_v10  ;;  %v128_v49 = vld [vmem:[#allocation2 + $0x318] sm:$0xff]  ;;  %v145_v51 = vld [vmem:[#allocation2 + $0x3a0] sm:$0xff]  ;;  %v94_v54 = vld [vmem:[#allocation2 + $0x208] sm:$0xff] }
  0x2c   :  { %270 = vmatpush.msrb.mxu0 %v105_v9  ;;  %329 = vmatpush.msrb.mxu3 %v154_v12  ;;  %v113_v55 = vld [vmem:[#allocation2 + $0x2a0] sm:$0xff]  ;;  %v127_v56 = vld [vmem:[#allocation2 + $0x310] sm:$0xff]  ;;  %v144_v57 = vld [vmem:[#allocation2 + $0x398] sm:$0xff]  ;;  %v174_v9 = vperm.slane %v463_v39, 7  ;;  %v172_v12 = vperm.slane %v463_v39, 5 }
  0x2d   :  { %310 = vmatpush.msrb.mxu2 %v137_v11  ;;  %289 = vmatpush.msrb.mxu1 %v122_v14  ;;  %v93_v59 = vld [vmem:[#allocation2 + $0x200] sm:$0xff]  ;;  %v112_v60 = vld [vmem:[#allocation2 + $0x298] sm:$0xff]  ;;  %v126_v61 = vld [vmem:[#allocation2 + $0x308] sm:$0xff] }
  0x2e   :  { %271 = vmatpush.msrb.mxu0 %v104_v13  ;;  %330 = vmatpush.msrb.mxu3 %v153_v16  ;;  %v143_v62 = vld [vmem:[#allocation2 + $0x390] sm:$0xff]  ;;  %v164_v63 = vld [vmem:[#allocation2 + $0x438] sm:$0xff]  ;;  %v125_v1 = vld [vmem:[#allocation2 + $0x300] sm:$0xff] }
  0x2f   :  { %311 = vmatpush.msrb.mxu2 %v136_v15  ;;  %290 = vmatpush.msrb.mxu1 %v121_v18  ;;  %v111_v0 = vld [vmem:[#allocation2 + $0x290] sm:$0xff]  ;;  %v142_v2 = vld [vmem:[#allocation2 + $0x388] sm:$0xff]  ;;  %v141_v6 = vld [vmem:[#allocation2 + $0x380] sm:$0xff] }
  0x30   :  { %272 = vmatpush.msrb.mxu0 %v103_v17  ;;  %331 = vmatpush.msrb.mxu3 %v152_v20  ;;  %v163_v3 = vld [vmem:[#allocation2 + $0x430] sm:$0xff]  ;;  %v110_v5 = vld [vmem:[#allocation2 + $0x288] sm:$0xff]  ;;  %v109_v10 = vld [vmem:[#allocation2 + $0x280] sm:$0xff] }
  0x31   :  { %312 = vmatpush.msrb.mxu2 %v135_v19  ;;  %291 = vmatpush.msrb.mxu1 %v120_v22  ;;  %v162_v7 = vld [vmem:[#allocation2 + $0x428] sm:$0xff]  ;;  %v161_v11 = vld [vmem:[#allocation2 + $0x420] sm:$0xff]  ;;  %v160_v13 = vld [vmem:[#allocation2 + $0x418] sm:$0xff] }
  0x32   :  { %273 = vmatpush.msrb.mxu0 %v102_v21  ;;  %332 = vmatpush.msrb.mxu3 %v151_v24  ;;  %v159_v14 = vld [vmem:[#allocation2 + $0x410] sm:$0xff]  ;;  %v158_v15 = vld [vmem:[#allocation2 + $0x408] sm:$0xff]  ;;  %v157_v16 = vld [vmem:[#allocation2 + $0x400] sm:$0xff] }
  0x33   :  { %313 = vmatpush.msrb.mxu2 %v134_v23  ;;  %292 = vmatpush.msrb.mxu1 %v119_v26  ;;  %v408_v17 = vld [vmem:[%s479_s0 + $0x8] ss:$0 sm:$0xff]  ;;  %s440_s0 = smov 64  }
  0x34   :  { %274 = vmatpush.msrb.mxu0 %v101_v25  ;;  %333 = vmatpush.msrb.mxu3 %v150_v28 }
  0x35   :  { %314 = vmatpush.msrb.mxu2 %v133_v27  ;;  %293 = vmatpush.msrb.mxu1 %v118_v30 }
  0x36   :  { %275 = vmatpush.msrb.mxu0 %v100_v29  ;;  %334 = vmatpush.msrb.mxu3 %v149_v32 }
  0x37   :  { %315 = vmatpush.msrb.mxu2 %v132_v31  ;;  %294 = vmatpush.msrb.mxu1 %v117_v34 }
  0x38   :  { %276 = vmatpush.msrb.mxu0 %v99_v33  ;;  %335 = vmatpush.msrb.mxu3 %v148_v36 }
  0x39   :  { %316 = vmatpush.msrb.mxu2 %v131_v35  ;;  %295 = vmatpush.msrb.mxu1 %v116_v38 }
  0x3a   :  { %277 = vmatpush.msrb.mxu0 %v98_v37  ;;  %336 = vmatpush.msrb.mxu3 %v147_v41 }
  0x3b   :  { %317 = vmatpush.msrb.mxu2 %v130_v40  ;;  %296 = vmatpush.msrb.mxu1 %v115_v43 }
  0x3c   :  { %278 = vmatpush.msrb.mxu0 %v97_v42  ;;  %337 = vmatpush.msrb.mxu3 %v146_v45 }
  0x3d   :  { %318 = vmatpush.msrb.mxu2 %v129_v44  ;;  %297 = vmatpush.msrb.mxu1 %v114_v48 }
  0x3e   :  { %279 = vmatpush.msrb.mxu0 %v96_v47  ;;  %243 = vmatmul.f32.vlgmr.msra.gmra.mxu2 %v169_v46 }
  0x3f   :  { %319 = vmatpush.msrb.mxu2 %v128_v49  ;;  %338 = vmatpush.msrb.mxu3 %v145_v51 }
  0x40   :  { %280 = vmatpush.msrb.mxu0 %v95_v50  ;;  %263 = vmatmul.f32.vlgmr.msra.gmra.mxu3 %v170_v53 }
  0x41   :  { %203 = vmatmul.f32.vlgmr.msra.gmra.mxu0 %v167_v52  ;;  %298 = vmatpush.msrb.mxu1 %v113_v55 }
  0x42   :  { %281 = vmatpush.msrb.mxu0 %v94_v54  ;;  %320 = vmatpush.msrb.mxu2 %v127_v56 }
  0x43   :  { %339 = vmatpush.msrb.mxu3 %v144_v57  ;;  %223 = vmatmul.f32.vlgmr.msra.gmra.mxu1 %v168_v58 }
  0x44   :  { %282 = vmatpush.msrb.mxu0 %v93_v59  ;;  %299 = vmatpush.msrb.mxu1 %v112_v60 }
  0x45   :  { %321 = vmatpush.msrb.mxu2 %v126_v61  ;;  %340 = vmatpush.msrb.mxu3 %v143_v62 }
  0x46   :  { %355 = vmatpush.msra.mxu0 %v164_v63  ;;  %300 = vmatpush.msrb.mxu1 %v111_v0 }
  0x47   :  { %322 = vmatpush.msrb.mxu2 %v125_v1  ;;  %341 = vmatpush.msrb.mxu3 %v142_v2 }
  0x48   :  { %356 = vmatpush.msra.mxu0 %v163_v3  ;;  %323 = vmatmul.f32.vlgmr.msrb.gmra.mxu2 %v173_v4 }
  0x49   :  { %301 = vmatpush.msrb.mxu1 %v110_v5  ;;  %342 = vmatpush.msrb.mxu3 %v141_v6 }
  0x4a   :  { %357 = vmatpush.msra.mxu0 %v162_v7  ;;  %343 = vmatmul.f32.vlgmr.msrb.gmra.mxu3 %v174_v9 }
  0x4b   :  { %283 = vmatmul.f32.vlgmr.msrb.gmra.mxu0 %v171_v8  ;;  %302 = vmatpush.msrb.mxu1 %v109_v10 }
  0x4c   :  { %358 = vmatpush.msra.mxu0 %v161_v11  ;;  %303 = vmatmul.f32.vlgmr.msrb.gmra.mxu1 %v172_v12 }
  0x4e   :  { %359 = vmatpush.msra.mxu0 %v160_v13 }
  0x50   :  { %360 = vmatpush.msra.mxu0 %v159_v14 }
  0x52   :  { %361 = vmatpush.msra.mxu0 %v158_v15 }
  0x54   :  { %362 = vmatpush.msra.mxu0 %v157_v16 }
  0x55   :  { %402 = vmatmul.msk.f32.vlgmr.msra.gmra.mxu0 %vm184_vm0, %v408_v17 }
  0xbe   :  { %v204_v18 = vpop.f32.mrf.mxu0 }
  0xc0   :  { %v224_v19 = vpop.f32.mrf.mxu1 }
  0xc1   :  { %v244_v20 = vpop.f32.mrf.mxu2  ;;  %v225_v21 = vadd.f32 %v224_v19, %v204_v18 }
  0xc3   :  { %v245_v22 = vadd.f32 %v244_v20, %v225_v21  ;;  %v264_v23 = vpop.f32.mrf.mxu3 }
  0xc5   :  { %v265_v24 = vadd.f32 %v264_v23, %v245_v22 }
  0xc8   :  { %v284_v25 = vpop.f32.mrf.mxu0 }
  0xc9   :  { %v285_v26 = vadd.f32 %v284_v25, %v265_v24  ;;  %v304_v27 = vpop.f32.mrf.mxu1 }
  0xcb   :  { %v305_v28 = vadd.f32 %v304_v27, %v285_v26  ;;  %v324_v29 = vpop.f32.mrf.mxu2 }
  0xcd   :  { %v325_v30 = vadd.f32 %v324_v29, %v305_v28  ;;  %v344_v31 = vpop.f32.mrf.mxu3 }
  0xcf   :  { %v345_v32 = vadd.f32 %v344_v31, %v325_v30 }
  0xd2   :  { %v364_v33 = vpop.f32.mrf.mxu0 }
  0xd3   :  { %v365_v34 = vadd.f32 %v364_v33, %v345_v32 }
  0xd5   :  { %368 = vrot.lane.b32.xlu0 %v365_v34, %s440_s0 }
 0x147   :  { %v369_v35 = vpop.permute.xlu0 %368 }
 0x148   :  { %409 = vrcp.f32 %v369_v35  ;;  %v382_v39 = vand.u32 2147483648, %v369_v35  ;;  %v380_v41 = vand.u32 2147483647, %v369_v35  ;;  %vm376_vm2 = vweird.f32 %v369_v35 }
 0x14a   :  { %v383_v43 = vor.u32 1.1754944e-38, %v382_v39  ;;  %vm381_vm4 = vcmp.eq.f32.partialorder %v380_v41, 8.507059e+37 }
 0x14e   :  { %v410_v36 = vpop.eup %409 }
 0x14f   :  { %v372_v37 = vmul.f32 %v410_v36, %v369_v35  ;;  %vm377_vm1 = vweird.f32 %v410_v36 }
 0x150   :  { %vm378_vm3 = vmor %vm376_vm2, %vm377_vm1 }
 0x151   :  { %v373_v38 = vsub.f32 1.0, %v372_v37 }
 0x153   :  { %v374_v40 = vmul.f32 %v410_v36, %v373_v38 }
 0x155   :  { %v375_v42 = vadd.f32 %v410_v36, %v374_v40 }
 0x157   :  { %v379_v44 = vsel %vm378_vm3, %v410_v36, %v375_v42 }
 0x158   :  { %v384_v45 = vsel %vm381_vm4, %v383_v43, %v379_v44 }
 0x159   :  { %v385_v46 = vmul.f32 %v384_v45, %v365_v34 }
 0x15b   :  { %387 = vrot.lane.b32.xlu0 %v385_v46, %s441_s19 }
 0x1cd   :  { %v388_v47 = vpop.permute.xlu0 %387 }
 0x1ce   :  { %v390_v48 = vadd.f32 %v388_v47, %v385_v46 }
 0x1d0   :  { %392 = vrot.lane.b32.xlu1 %v390_v48, %s440_s0 }
 0x242   :  { %v393_v49 = vpop.permute.xlu1 %392 }
 0x243   :  { %396 = vst.msk [vmem:[%s481_s2] sm:$0x1] %vm395_vm5, %v393_v49 }
 0x244   :  { %401 = vsyncpa [#allocation3], 1 }

</bundles_post_ra>
